<compile_context>
chip_gen: v6e
topology: v6e:2x2x1
jax: 0.10.0
libtpu: 0.0.40
codegen_flags: <defaults>
</compile_context>

<pallas_src>
import functools
import math

import jax
import jax.numpy as jnp
from jax import lax
from jax.experimental import pallas as pl
from jax.experimental.pallas import tpu as pltpu


def _round_up(a, m):
    return (a + m - 1) // m * m


def _vmem_cap_bytes():
    try:
        info = pltpu.get_tpu_info()
        cap = getattr(info, "vmem_capacity_bytes", None)
        if cap:
            return int(cap)
    except Exception:
        pass
    return 64 * 1024 * 1024  # conservative: v7x physical VMEM per TensorCore


def _vmem_limit(est_bytes):
    cap = _vmem_cap_bytes()
    return int(min(max(2 * est_bytes, 16 * 1024 * 1024), int(0.8 * cap)))


def _const_spec(shape):
    """Constant-index block: weight stays VMEM resident; single-buffered."""
    idx = lambda *_: (0,) * len(shape)
    try:
        return pl.BlockSpec(shape, idx, pipeline_mode=pl.Buffered(1))
    except Exception:
        return pl.BlockSpec(shape, idx)


# ----------------------------------------------------------------------------
# Pass 1: LayerNorm + Q/K/V projections (computed once per row tile).
# ----------------------------------------------------------------------------
def _proj_kernel(E_true, scale, eps,
                 x_ref, lnw_ref, lnb_ref,
                 wq_ref, bq_ref, wk_ref, bk_ref, wv_ref, bv_ref,
                 xn_ref, q_ref, k_ref, v_ref):
    f32 = jnp.float32
    bf16 = jnp.bfloat16
    E_pad = x_ref.shape[1]

    x = x_ref[...]
    # LayerNorm over the true embedding width only (padded columns are zero).
    mean = jnp.sum(x, axis=-1, keepdims=True) * (1.0 / E_true)
    diff = x - mean
    if E_pad > E_true:
        col = lax.broadcasted_iota(jnp.int32, x.shape, 1)
        diff = jnp.where(col < E_true, diff, 0.0)
    var = jnp.sum(diff * diff, axis=-1, keepdims=True) * (1.0 / E_true)
    xn = diff * lax.rsqrt(var + eps) * lnw_ref[...] + lnb_ref[...]
    xn_ref[...] = xn

    xnb = xn.astype(bf16)
    q = jnp.dot(xnb, wq_ref[...], preferred_element_type=f32) + bq_ref[...]
    q_ref[...] = (q * scale).astype(bf16)          # fold 1/sqrt(q_k_size) once
    k = jnp.dot(xnb, wk_ref[...], preferred_element_type=f32) + bk_ref[...]
    k_ref[...] = k.astype(bf16)
    v = jnp.dot(xnb, wv_ref[...], preferred_element_type=f32) + bv_ref[...]
    v_ref[...] = v.astype(bf16)


# ----------------------------------------------------------------------------
# Pass 2: flash-style attention + fused residuals + output projection.
# ----------------------------------------------------------------------------
def _flash_kernel(S_true, S_pad, nq,
                  x_ref, xn_ref, q_ref, k_ref, v_ref, wp_ref, bp_ref,
                  o_ref, m_scr, l_scr, acc_scr):
    qi = pl.program_id(0)
    ki = pl.program_id(1)
    nk = pl.num_programs(1)
    f32 = jnp.float32
    bf16 = jnp.bfloat16
    TQ = q_ref.shape[0]
    TK = k_ref.shape[0]

    @pl.when(ki == 0)
    def _init():
        m_scr[...] = jnp.full(m_scr.shape, -jnp.inf, f32)
        l_scr[...] = jnp.zeros(l_scr.shape, f32)
        acc_scr[...] = jnp.zeros(acc_scr.shape, f32)

    # Fully-masked key tiles (ki < qi: every col <= every row -> all -1e9) are
    # skipped: once any unmasked tile is processed, alpha = exp(-1e9 - m)
    # underflows to 0 and wipes their contribution anyway.  The only row with
    # zero unmasked keys is the global last row (uniform softmax), which lives
    # in query tile nq-1, so that tile processes everything.
    last_q = nq - 1
    active = jnp.logical_or(ki >= qi, qi == last_q)

    @pl.when(active)
    def _accumulate():
        # q @ k^T without materializing a transpose (contract last dims, MXU).
        scores = lax.dot_general(
            q_ref[...], k_ref[...],
            dimension_numbers=(((1,), (1,)), ((), ())),
            preferred_element_type=f32)                       # (TQ, TK)

        row = lax.broadcasted_iota(jnp.int32, (TQ, TK), 0) + qi * TQ
        col = lax.broadcasted_iota(jnp.int32, (TQ, TK), 1) + ki * TK
        # Causal-quirk mask (torch.tril -> LOWER triangle incl. diag = -1e9),
        # then padded keys at -1e30 so they vanish even from the all-(-1e9)
        # last row.  The padding select must stay outermost.
        masked = jnp.where(col <= row, jnp.float32(-1e9), scores)
        if S_pad > S_true:
            masked = jnp.where(col >= S_true, jnp.float32(-1e30), masked)

        # Online (flash) softmax accumulation over key tiles.
        m_prev = m_scr[...]
        m_new = jnp.maximum(m_prev, jnp.max(masked, axis=-1, keepdims=True))
        alpha = jnp.exp(m_prev - m_new)
        # TODO(synk): on v6e/v7x a bf16 exp (EUP) ~doubles transcendental
        # throughput; kept f32 for numerical parity with the reference.
        p = jnp.exp(masked - m_new)
        l_scr[...] = alpha * l_scr[...] + jnp.sum(p, axis=-1, keepdims=True)
        acc_scr[...] = alpha * acc_scr[...] + jnp.dot(
            p.astype(bf16), v_ref[...], preferred_element_type=f32)
        m_scr[...] = m_new

    @pl.when(ki == nk - 1)
    def _finalize():
        inv_l = pl.reciprocal(l_scr[...], approx=True)
        att = acc_scr[...] * inv_l + xn_ref[...]      # residual w/ normed input
        proj = jnp.dot(att.astype(bf16), wp_ref[...],
                       preferred_element_type=f32) + bp_ref[...]
        o_ref[...] = proj + x_ref[...]                # outer residual w/ raw x


# ----------------------------------------------------------------------------
# Wrapper
# ----------------------------------------------------------------------------
def attention_forward(x, params, q_k_size, eps=1e-5, block_s=256):
    """x: (S, E) float32; params: dict of pre-transposed (in, out) weights."""
    S, E = x.shape
    HDK = params["wq"].shape[1]
    HDV = params["wv"].shape[1]
    assert params["wk"].shape[1] == HDK
    assert HDV == E, "module residual requires n_head * v_size == embedding_dim"

    E_pad = _round_up(E, 128)
    HDK_pad = _round_up(HDK, 128)
    HDV_pad = _round_up(HDV, 128)
    # Row tile: capped by block_s, but no larger than needed to give the
    # parallel q axis >= 2 tiles when S permits (both v7x TensorCores busy).
    # TODO(synk): decouple TQ/TK per generation (v5e prefers TK=128).
    T = min(block_s, max(8, _round_up((S + 1) // 2, 8)))
    S_pad = _round_up(S, T)
    ns = S_pad // T

    def pad2(a, rows, cols, dtype=jnp.float32):
        a = a.astype(jnp.float32)
        return jnp.pad(a, ((0, rows - a.shape[0]),
                           (0, cols - a.shape[1]))).astype(dtype)

    bf16 = jnp.bfloat16
    xp = pad2(x, S_pad, E_pad)
    lnw = pad2(params["ln_w"], 1, E_pad)
    lnb = pad2(params["ln_b"], 1, E_pad)
    wq = pad2(params["wq"], E_pad, HDK_pad, bf16)
    bq = pad2(params["bq"], 1, HDK_pad)
    wk = pad2(params["wk"], E_pad, HDK_pad, bf16)
    bk = pad2(params["bk"], 1, HDK_pad)
    wv = pad2(params["wv"], E_pad, HDV_pad, bf16)
    bv = pad2(params["bv"], 1, HDV_pad)
    wp = pad2(params["wp"], E_pad, E_pad, bf16)
    bp = pad2(params["bp"], 1, E_pad)

    scale = 1.0 / math.sqrt(q_k_size)

    # ---------------- Pass 1: LN + Q/K/V projections -------------------------
    est1 = (2 * T * E_pad * 4 * 2                                   # x in, xn out
            + (2 * T * HDK_pad + T * HDV_pad) * 2 * 2               # q/k/v out (bf16)
            + E_pad * (2 * HDK_pad + HDV_pad) * 2                   # weights (1 buf)
            + (2 * HDK_pad + HDV_pad + 2 * E_pad) * 4)              # biases / ln
    proj_kernel = functools.partial(_proj_kernel, E, scale, eps)
    xn, qm, km, vm = pl.pallas_call(
        proj_kernel,
        out_shape=(
            jax.ShapeDtypeStruct((S_pad, E_pad), jnp.float32),
            jax.ShapeDtypeStruct((S_pad, HDK_pad), jnp.bfloat16),
            jax.ShapeDtypeStruct((S_pad, HDK_pad), jnp.bfloat16),
            jax.ShapeDtypeStruct((S_pad, HDV_pad), jnp.bfloat16),
        ),
        grid_spec=pltpu.PrefetchScalarGridSpec(
            num_scalar_prefetch=0,
            grid=(ns,),
            in_specs=[
                pl.BlockSpec((T, E_pad), lambda i: (i, 0)),          # x rows
                _const_spec((1, E_pad)), _const_spec((1, E_pad)),    # ln w / b
                _const_spec((E_pad, HDK_pad)), _const_spec((1, HDK_pad)),  # wq/bq
                _const_spec((E_pad, HDK_pad)), _const_spec((1, HDK_pad)),  # wk/bk
                _const_spec((E_pad, HDV_pad)), _const_spec((1, HDV_pad)),  # wv/bv
            ],
            out_specs=(
                pl.BlockSpec((T, E_pad), lambda i: (i, 0)),
                pl.BlockSpec((T, HDK_pad), lambda i: (i, 0)),
                pl.BlockSpec((T, HDK_pad), lambda i: (i, 0)),
                pl.BlockSpec((T, HDV_pad), lambda i: (i, 0)),
            ),
        ),
        compiler_params=pltpu.CompilerParams(
            dimension_semantics=("parallel",),
            vmem_limit_bytes=_vmem_limit(est1)),
    )(xp, lnw, lnb, wq, bq, wk, bk, wv, bv)

    # ---------------- Pass 2: flash attention + residuals + projection -------
    last_q = ns - 1

    def kv_index(qi, ki):
        # Redirect the DMA of skipped (fully-masked) tiles to block `qi`,
        # which is needed at the diagonal step anyway -> no wasted bandwidth.
        skip = jnp.logical_and(ki < qi, qi != last_q)
        return (jnp.where(skip, qi, ki), 0)

    est2 = (2 * T * E_pad * 4 * 2                                   # x, xn tiles
            + T * HDK_pad * 2 * 2                                   # q tile
            + (T * HDK_pad + T * HDV_pad) * 2 * 2                   # k, v tiles
            + E_pad * E_pad * 2 + E_pad * 4                         # wp (1 buf), bp
            + T * E_pad * 4 * 2                                     # out tile
            + T * (HDV_pad + 2) * 4                                 # scratch
            + 2 * T * T * 4)                                        # scores/p headroom
    flash_kernel = functools.partial(_flash_kernel, S, S_pad, ns)
    out = pl.pallas_call(
        flash_kernel,
        out_shape=jax.ShapeDtypeStruct((S_pad, E_pad), jnp.float32),
        grid_spec=pltpu.PrefetchScalarGridSpec(
            num_scalar_prefetch=0,
            grid=(ns, ns),
            in_specs=[
                pl.BlockSpec((T, E_pad), lambda qi, ki: (qi, 0)),    # raw x rows
                pl.BlockSpec((T, E_pad), lambda qi, ki: (qi, 0)),    # xn rows
                pl.BlockSpec((T, HDK_pad), lambda qi, ki: (qi, 0)),  # q rows (bf16)
                pl.BlockSpec((T, HDK_pad), kv_index),                # k rows (bf16)
                pl.BlockSpec((T, HDV_pad), kv_index),                # v rows (bf16)
                _const_spec((E_pad, E_pad)),                         # wp
                _const_spec((1, E_pad)),                             # bp
            ],
            out_specs=pl.BlockSpec((T, E_pad), lambda qi, ki: (qi, 0)),
            scratch_shapes=[
                pltpu.VMEM((T, 1), jnp.float32),        # running max m
                pltpu.VMEM((T, 1), jnp.float32),        # running denom l
                pltpu.VMEM((T, HDV_pad), jnp.float32),  # output accumulator
            ],
        ),
        compiler_params=pltpu.CompilerParams(
            dimension_semantics=("parallel", "arbitrary"),
            vmem_limit_bytes=_vmem_limit(est2)),
    )(xp, xn, qm, km, vm, wp, bp)
    return out[:S, :E]


# ----------------------------------------------------------------------------
# Params / reference / test harness
# ----------------------------------------------------------------------------
def init_params(key, embedding_dim, q_k_size, v_size, n_head):
    """Deterministic init mimicking PyTorch defaults (uniform +-1/sqrt(fan_in))."""
    E = embedding_dim
    hdk = n_head * q_k_size
    hdv = n_head * v_size
    ks = jax.random.split(key, 8)
    bound = 1.0 / math.sqrt(E)

    def lin(kw, kb, out_dim):
        w = jax.random.uniform(kw, (E, out_dim), jnp.float32, -bound, bound)
        b = jax.random.uniform(kb, (1, out_dim), jnp.float32, -bound, bound)
        return w, b

    wq, bq = lin(ks[0], ks[1], hdk)
    wk, bk = lin(ks[2], ks[3], hdk)
    wv, bv = lin(ks[4], ks[5], hdv)
    wp, bp = lin(ks[6], ks[7], E)
    return dict(
        ln_w=jnp.ones((1, E), jnp.float32),
        ln_b=jnp.zeros((1, E), jnp.float32),
        wq=wq, bq=bq, wk=wk, bk=bk, wv=wv, bv=bv, wp=wp, bp=bp,
    )


def reference_forward(x, params, q_k_size, eps=1e-5, matmul_dtype=jnp.float32):
    """Plain-JAX reference mirroring the PyTorch code (optionally with the same
    bf16-operand / f32-accumulate matmuls the kernel uses)."""
    md = matmul_dtype

    def mm(a, w):
        return jnp.dot(a.astype(md), w.astype(md),
                       preferred_element_type=jnp.float32)

    mean = jnp.mean(x, axis=-1, keepdims=True)
    var = jnp.mean((x - mean) ** 2, axis=-1, keepdims=True)
    xn = (x - mean) * lax.rsqrt(var + eps) * params["ln_w"] + params["ln_b"]
    q = (mm(xn, params["wq"]) + params["bq"]) * (1.0 / math.sqrt(q_k_size))
    k = mm(xn, params["wk"]) + params["bk"]
    v = mm(xn, params["wv"]) + params["bv"]
    scores = mm(q, k.T)
    s = x.shape[0]
    tril = jnp.tril(jnp.ones((s, s), dtype=bool))
    scores = jnp.where(tril, jnp.float32(-1e9), scores)
    p = jax.nn.softmax(scores, axis=-1)
    att = mm(p, v) + xn
    return mm(att, params["wp"]) + params["bp"] + x


def _run_case(S, embedding_dim, q_k_size, v_size, n_head, block_s):
    key = jax.random.PRNGKey(0)
    kx, kp = jax.random.split(key)
    x = jax.random.normal(kx, (S, embedding_dim), jnp.float32)
    params = init_params(kp, embedding_dim, q_k_size, v_size, n_head)

    out = attention_forward(x, params, q_k_size, block_s=block_s)
    out = jax.block_until_ready(out)
    assert out.shape == (S, embedding_dim)

    ref_mixed = reference_forward(x, params, q_k_size, matmul_dtype=jnp.bfloat16)
    ref_f32 = reference_forward(x, params, q_k_size, matmul_dtype=jnp.float32)
    d_mixed = float(jnp.max(jnp.abs(out - ref_mixed)))
    d_f32 = float(jnp.max(jnp.abs(out - ref_f32)))
    assert jnp.allclose(out, ref_mixed, atol=1e-2, rtol=1e-2), \
        f"mismatch vs bf16-matmul reference (max abs diff {d_mixed})"
    assert jnp.allclose(out, ref_f32, atol=1e-1, rtol=1e-1), \
        f"mismatch vs f32 reference (max abs diff {d_f32})"
    return out


if __name__ == "__main__":
    # Small shapes consistent with the module: n_head * v_size must equal
    # embedding_dim for the in-module residual to broadcast.
    _run_case(S=8, embedding_dim=32, q_k_size=8, v_size=8, n_head=4, block_s=256)
    # 2x2 flash grid plus S/E padding.
    _run_case(S=500, embedding_dim=96, q_k_size=24, v_size=24, n_head=4, block_s=256)
    # 5x5 grid: exercises the fully-masked-tile skip + DMA redirect path.
    _run_case(S=600, embedding_dim=96, q_k_size=24, v_size=24, n_head=4, block_s=128)
    print("KERNEL_OK")
</pallas_src>

<mosaic_0001>
module attributes {stable_mosaic.version = 11 : i64} {
  func.func @_proj_kernel(%arg0: i32, %arg1: memref<8x128xf32, #tpu.memory_space<vmem>>, %arg2: memref<1x128xf32, #tpu.memory_space<vmem>>, %arg3: memref<1x128xf32, #tpu.memory_space<vmem>>, %arg4: memref<128x128xbf16, #tpu.memory_space<vmem>>, %arg5: memref<1x128xf32, #tpu.memory_space<vmem>>, %arg6: memref<128x128xbf16, #tpu.memory_space<vmem>>, %arg7: memref<1x128xf32, #tpu.memory_space<vmem>>, %arg8: memref<128x128xbf16, #tpu.memory_space<vmem>>, %arg9: memref<1x128xf32, #tpu.memory_space<vmem>>, %arg10: memref<8x128xf32, #tpu.memory_space<vmem>>, %arg11: memref<8x128xbf16, #tpu.memory_space<vmem>>, %arg12: memref<8x128xbf16, #tpu.memory_space<vmem>>, %arg13: memref<8x128xbf16, #tpu.memory_space<vmem>>) attributes {dimension_semantics = [#tpu.dimension_semantics<parallel>], iteration_bounds = array<i64: 1>, scalar_prefetch = 0 : i64, scratch_operands = 0 : i64, tpu.core_type = #tpu.core_type<tc>, window_params = [{transform_indices = @transform_0, window_bounds = array<i64: 8, 128>}, {pipeline_mode = #tpu.pipeline_mode<synchronous>, transform_indices = @transform_1, window_bounds = array<i64: 1, 128>}, {pipeline_mode = #tpu.pipeline_mode<synchronous>, transform_indices = @transform_2, window_bounds = array<i64: 1, 128>}, {pipeline_mode = #tpu.pipeline_mode<synchronous>, transform_indices = @transform_3, window_bounds = array<i64: 128, 128>}, {pipeline_mode = #tpu.pipeline_mode<synchronous>, transform_indices = @transform_4, window_bounds = array<i64: 1, 128>}, {pipeline_mode = #tpu.pipeline_mode<synchronous>, transform_indices = @transform_5, window_bounds = array<i64: 128, 128>}, {pipeline_mode = #tpu.pipeline_mode<synchronous>, transform_indices = @transform_6, window_bounds = array<i64: 1, 128>}, {pipeline_mode = #tpu.pipeline_mode<synchronous>, transform_indices = @transform_7, window_bounds = array<i64: 128, 128>}, {pipeline_mode = #tpu.pipeline_mode<synchronous>, transform_indices = @transform_8, window_bounds = array<i64: 1, 128>}, {transform_indices = @transform_9, window_bounds = array<i64: 8, 128>}, {transform_indices = @transform_10, window_bounds = array<i64: 8, 128>}, {transform_indices = @transform_11, window_bounds = array<i64: 8, 128>}, {transform_indices = @transform_12, window_bounds = array<i64: 8, 128>}]} {
    %c0 = arith.constant 0 : index
    %c0_0 = arith.constant 0 : index
    %0 = vector.load %arg1[%c0, %c0_0] : memref<8x128xf32, #tpu.memory_space<vmem>>, vector<8x128xf32>
    %cst = arith.constant dense<0.000000e+00> : vector<8xf32>
    %1 = vector.multi_reduction <add>, %0, %cst [1] : vector<8x128xf32> to vector<8xf32>
    %2 = vector.shape_cast %1 : vector<8xf32> to vector<8x1xf32>
    %cst_1 = arith.constant 3.125000e-02 : f32
    %3 = vector.broadcast %cst_1 : f32 to vector<8x1xf32>
    %4 = arith.mulf %2, %3 : vector<8x1xf32>
    %5 = vector.broadcast %4 : vector<8x1xf32> to vector<8x128xf32>
    %6 = arith.subf %0, %5 : vector<8x128xf32>
    %7 = tpu.iota {dimensions = array<i32: 1>} : vector<8x128xi32>
    %c32_i32 = arith.constant 32 : i32
    %8 = vector.broadcast %c32_i32 : i32 to vector<8x128xi32>
    %9 = arith.cmpi slt, %7, %8 : vector<8x128xi32>
    %cst_2 = arith.constant 0.000000e+00 : f32
    %10 = vector.broadcast %cst_2 : f32 to vector<8x128xf32>
    %11 = arith.select %9, %6, %10 : vector<8x128xi1>, vector<8x128xf32>
    %12 = arith.mulf %11, %11 : vector<8x128xf32>
    %cst_3 = arith.constant dense<0.000000e+00> : vector<8xf32>
    %13 = vector.multi_reduction <add>, %12, %cst_3 [1] : vector<8x128xf32> to vector<8xf32>
    %14 = vector.shape_cast %13 : vector<8xf32> to vector<8x1xf32>
    %cst_4 = arith.constant 3.125000e-02 : f32
    %15 = vector.broadcast %cst_4 : f32 to vector<8x1xf32>
    %16 = arith.mulf %14, %15 : vector<8x1xf32>
    %cst_5 = arith.constant 9.99999974E-6 : f32
    %17 = vector.broadcast %cst_5 : f32 to vector<8x1xf32>
    %18 = arith.addf %16, %17 : vector<8x1xf32>
    %19 = math.rsqrt %18 : vector<8x1xf32>
    %20 = vector.broadcast %19 : vector<8x1xf32> to vector<8x128xf32>
    %21 = arith.mulf %11, %20 : vector<8x128xf32>
    %c0_6 = arith.constant 0 : index
    %c0_7 = arith.constant 0 : index
    %22 = vector.load %arg2[%c0_6, %c0_7] : memref<1x128xf32, #tpu.memory_space<vmem>>, vector<1x128xf32>
    %23 = vector.broadcast %22 : vector<1x128xf32> to vector<8x128xf32>
    %24 = arith.mulf %21, %23 : vector<8x128xf32>
    %c0_8 = arith.constant 0 : index
    %c0_9 = arith.constant 0 : index
    %25 = vector.load %arg3[%c0_8, %c0_9] : memref<1x128xf32, #tpu.memory_space<vmem>>, vector<1x128xf32>
    %26 = vector.broadcast %25 : vector<1x128xf32> to vector<8x128xf32>
    %27 = arith.addf %24, %26 : vector<8x128xf32>
    %c0_10 = arith.constant 0 : index
    %c0_11 = arith.constant 0 : index
    %28 = vector.load %arg10[%c0_10, %c0_11] : memref<8x128xf32, #tpu.memory_space<vmem>>, vector<8x128xf32>
    tpu.vector_store %arg10[%c0_10, %c0_11], %27 {strides = array<i32>} : memref<8x128xf32, #tpu.memory_space<vmem>>, vector<8x128xf32>,
    %29 = arith.truncf %27 : vector<8x128xf32> to vector<8x128xbf16>
    %c0_12 = arith.constant 0 : index
    %c0_13 = arith.constant 0 : index
    %30 = vector.load %arg4[%c0_12, %c0_13] : memref<128x128xbf16, #tpu.memory_space<vmem>>, vector<128x128xbf16>
    %cst_14 = arith.constant dense<0.000000e+00> : vector<8x128xf32>
    %31 = tpu.matmul %29, %30, %cst_14 {dimension_numbers = #tpu.dot_dimension_numbers<[1], [0], [0], [1], [0, 0, 1, 1], [], []>} : vector<8x128xbf16>, vector<128x128xbf16>, vector<8x128xf32> -> vector<8x128xf32>
    %c0_15 = arith.constant 0 : index
    %c0_16 = arith.constant 0 : index
    %32 = vector.load %arg5[%c0_15, %c0_16] : memref<1x128xf32, #tpu.memory_space<vmem>>, vector<1x128xf32>
    %33 = vector.broadcast %32 : vector<1x128xf32> to vector<8x128xf32>
    %34 = arith.addf %31, %33 : vector<8x128xf32>
    %cst_17 = arith.constant 0.353553385 : f32
    %35 = vector.broadcast %cst_17 : f32 to vector<8x128xf32>
    %36 = arith.mulf %34, %35 : vector<8x128xf32>
    %37 = arith.truncf %36 : vector<8x128xf32> to vector<8x128xbf16>
    %c0_18 = arith.constant 0 : index
    %c0_19 = arith.constant 0 : index
    %38 = vector.load %arg11[%c0_18, %c0_19] : memref<8x128xbf16, #tpu.memory_space<vmem>>, vector<8x128xbf16>
    tpu.vector_store %arg11[%c0_18, %c0_19], %37 {strides = array<i32>} : memref<8x128xbf16, #tpu.memory_space<vmem>>, vector<8x128xbf16>,
    %c0_20 = arith.constant 0 : index
    %c0_21 = arith.constant 0 : index
    %39 = vector.load %arg6[%c0_20, %c0_21] : memref<128x128xbf16, #tpu.memory_space<vmem>>, vector<128x128xbf16>
    %cst_22 = arith.constant dense<0.000000e+00> : vector<8x128xf32>
    %40 = tpu.matmul %29, %39, %cst_22 {dimension_numbers = #tpu.dot_dimension_numbers<[1], [0], [0], [1], [0, 0, 1, 1], [], []>} : vector<8x128xbf16>, vector<128x128xbf16>, vector<8x128xf32> -> vector<8x128xf32>
    %c0_23 = arith.constant 0 : index
    %c0_24 = arith.constant 0 : index
    %41 = vector.load %arg7[%c0_23, %c0_24] : memref<1x128xf32, #tpu.memory_space<vmem>>, vector<1x128xf32>
    %42 = vector.broadcast %41 : vector<1x128xf32> to vector<8x128xf32>
    %43 = arith.addf %40, %42 : vector<8x128xf32>
    %44 = arith.truncf %43 : vector<8x128xf32> to vector<8x128xbf16>
    %c0_25 = arith.constant 0 : index
    %c0_26 = arith.constant 0 : index
    %45 = vector.load %arg12[%c0_25, %c0_26] : memref<8x128xbf16, #tpu.memory_space<vmem>>, vector<8x128xbf16>
    tpu.vector_store %arg12[%c0_25, %c0_26], %44 {strides = array<i32>} : memref<8x128xbf16, #tpu.memory_space<vmem>>, vector<8x128xbf16>,
    %c0_27 = arith.constant 0 : index
    %c0_28 = arith.constant 0 : index
    %46 = vector.load %arg8[%c0_27, %c0_28] : memref<128x128xbf16, #tpu.memory_space<vmem>>, vector<128x128xbf16>
    %cst_29 = arith.constant dense<0.000000e+00> : vector<8x128xf32>
    %47 = tpu.matmul %29, %46, %cst_29 {dimension_numbers = #tpu.dot_dimension_numbers<[1], [0], [0], [1], [0, 0, 1, 1], [], []>} : vector<8x128xbf16>, vector<128x128xbf16>, vector<8x128xf32> -> vector<8x128xf32>
    %c0_30 = arith.constant 0 : index
    %c0_31 = arith.constant 0 : index
    %48 = vector.load %arg9[%c0_30, %c0_31] : memref<1x128xf32, #tpu.memory_space<vmem>>, vector<1x128xf32>
    %49 = vector.broadcast %48 : vector<1x128xf32> to vector<8x128xf32>
    %50 = arith.addf %47, %49 : vector<8x128xf32>
    %51 = arith.truncf %50 : vector<8x128xf32> to vector<8x128xbf16>
    %c0_32 = arith.constant 0 : index
    %c0_33 = arith.constant 0 : index
    %52 = vector.load %arg13[%c0_32, %c0_33] : memref<8x128xbf16, #tpu.memory_space<vmem>>, vector<8x128xbf16>
    tpu.vector_store %arg13[%c0_32, %c0_33], %51 {strides = array<i32>} : memref<8x128xbf16, #tpu.memory_space<vmem>>, vector<8x128xbf16>,
    return
  }
  func.func @transform_0(%arg0: i32) -> (i32, i32) {
    %c0_i32 = arith.constant 0 : i32
    %c0_i32_0 = arith.constant 0 : i32
    return %arg0, %c0_i32 : i32, i32
  }
  func.func @transform_1(%arg0: i32) -> (i32, i32) {
    %c0_i32 = arith.constant 0 : i32
    %c0_i32_0 = arith.constant 0 : i32
    %c0_i32_1 = arith.constant 0 : i32
    return %c0_i32, %c0_i32_0 : i32, i32
  }
  func.func @transform_2(%arg0: i32) -> (i32, i32) {
    %c0_i32 = arith.constant 0 : i32
    %c0_i32_0 = arith.constant 0 : i32
    %c0_i32_1 = arith.constant 0 : i32
    return %c0_i32, %c0_i32_0 : i32, i32
  }
  func.func @transform_3(%arg0: i32) -> (i32, i32) {
    %c0_i32 = arith.constant 0 : i32
    %c0_i32_0 = arith.constant 0 : i32
    %c0_i32_1 = arith.constant 0 : i32
    return %c0_i32, %c0_i32_0 : i32, i32
  }
  func.func @transform_4(%arg0: i32) -> (i32, i32) {
    %c0_i32 = arith.constant 0 : i32
    %c0_i32_0 = arith.constant 0 : i32
    %c0_i32_1 = arith.constant 0 : i32
    return %c0_i32, %c0_i32_0 : i32, i32
  }
  func.func @transform_5(%arg0: i32) -> (i32, i32) {
    %c0_i32 = arith.constant 0 : i32
    %c0_i32_0 = arith.constant 0 : i32
    %c0_i32_1 = arith.constant 0 : i32
    return %c0_i32, %c0_i32_0 : i32, i32
  }
  func.func @transform_6(%arg0: i32) -> (i32, i32) {
    %c0_i32 = arith.constant 0 : i32
    %c0_i32_0 = arith.constant 0 : i32
    %c0_i32_1 = arith.constant 0 : i32
    return %c0_i32, %c0_i32_0 : i32, i32
  }
  func.func @transform_7(%arg0: i32) -> (i32, i32) {
    %c0_i32 = arith.constant 0 : i32
    %c0_i32_0 = arith.constant 0 : i32
    %c0_i32_1 = arith.constant 0 : i32
    return %c0_i32, %c0_i32_0 : i32, i32
  }
  func.func @transform_8(%arg0: i32) -> (i32, i32) {
    %c0_i32 = arith.constant 0 : i32
    %c0_i32_0 = arith.constant 0 : i32
    %c0_i32_1 = arith.constant 0 : i32
    return %c0_i32, %c0_i32_0 : i32, i32
  }
  func.func @transform_9(%arg0: i32) -> (i32, i32) {
    %c0_i32 = arith.constant 0 : i32
    %c0_i32_0 = arith.constant 0 : i32
    return %arg0, %c0_i32 : i32, i32
  }
  func.func @transform_10(%arg0: i32) -> (i32, i32) {
    %c0_i32 = arith.constant 0 : i32
    %c0_i32_0 = arith.constant 0 : i32
    return %arg0, %c0_i32 : i32, i32
  }
  func.func @transform_11(%arg0: i32) -> (i32, i32) {
    %c0_i32 = arith.constant 0 : i32
    %c0_i32_0 = arith.constant 0 : i32
    return %arg0, %c0_i32 : i32, i32
  }
  func.func @transform_12(%arg0: i32) -> (i32, i32) {
    %c0_i32 = arith.constant 0 : i32
    %c0_i32_0 = arith.constant 0 : i32
    return %arg0, %c0_i32 : i32, i32
  }
}

</mosaic_0001>

<bundles_post_ra>
// kernel: tpu_custom_call.1
= control target key start
LH: loop header
LB: loop body
LE: loop exit
PB: predicated region body
PF: predicated region fallthrough
CT: control target
= control target key end

     0   :  { %18 = vsyncpa [#allocation3], 0  ;;  %s1006_s0 = inlined_call_operand.hbm [shape: f32[8,128], index: 0, kind: input, shape index: {}]   ;;  %s1007_s1 = inlined_call_operand.vmem [shape: f32[1,128], index: 1, kind: input, shape index: {}]   ;;  %s1008_s2 = inlined_call_operand.vmem [shape: f32[1,128], index: 2, kind: input, shape index: {}]   ;;  %s1009_s3 = inlined_call_operand.hbm [shape: bf16[128,128], index: 3, kind: input, shape index: {}]   ;;  %s1010_s4 = inlined_call_operand.vmem [shape: f32[1,128], index: 4, kind: input, shape index: {}]   ;;  %s1011_s5 = inlined_call_operand.hbm [shape: bf16[128,128], index: 5, kind: input, shape index: {}]   ;;  %s1012_s6 = inlined_call_operand.vmem [shape: f32[1,128], index: 6, kind: input, shape index: {}]   ;;  %s1013_s7 = inlined_call_operand.hbm [shape: bf16[128,128], index: 7, kind: input, shape index: {}]   ;;  %s1014_s8 = inlined_call_operand.vmem [shape: f32[1,128], index: 8, kind: input, shape index: {}]   ;;  %s1015_s9 = inlined_call_operand.hbm [shape: f32[8,128], index: 9, kind: output, shape index: {0}]   ;;  %s1016_s10 = inlined_call_operand.hbm [shape: bf16[8,128], index: 10, kind: output, shape index: {1}]   ;;  %s1017_s11 = inlined_call_operand.hbm [shape: bf16[8,128], index: 11, kind: output, shape index: {2}]   ;;  %s1018_s12 = inlined_call_operand.hbm [shape: bf16[8,128], index: 12, kind: output, shape index: {3}]  }
   0x1   :  { %19 = vsyncpa [#allocation6], 0 }
   0x2   :  { %20 = vsyncpa [#allocation9], 0 }
   0x3   :  { %21 = vsyncpa [#allocation4], 0 }
   0x4   :  { %22 = vsyncpa [#allocation12], 0 }
   0x5   :  { %23 = vsyncpa [#allocation15], 0  ;;  %s851_s21 = smov [#allocation5]  }
   0x6   :  { %s43_s22 = sshll.u32 %s851_s21, 4  ;;  %s44_s22 = int_to_ptr.vmem [resolvable:$true] %s43_s22 }
   0x7   :  { %s687_s23 = scalar_lea.vmem %s44_s22, 1024  ;;  %p692_p1 = scmp.lt.s32.totalorder %s44_s22, %s44_s22 }
   0x8   :  { %p688_p0 = scmp.ne.s32.totalorder %s44_s22, %s687_s23  ;;  %p693_p2 = scmp.lt.s32.totalorder %s687_s23, %s687_s23 }
   0xa   :  { %p694_p3 = por %p693_p2, %p692_p1 }
   0xc   :  { %p695_p4 = pnand %p694_p3, %p688_p0 }
   0xe   :  { %698 = shalt.err (!%p695_p4)
}
   0xf   :  { %s852_s24 = smov 64   ;;  %s853_s25 = smov 4  }
  0x10   :  { %49 = dma.hbm_to_vmem [thread:$0]  %s1009_s3, 1024, %s44_s22, [#allocation6], %s852_s24, %s852_s24, %s853_s25  }
  0x11   :  { %s854_s28 = smov [#allocation2]   ;;  %s855_s30 = smov [#allocation7]  }
  0x12   :  { %s30_s29 = sshll.u32 %s854_s28, 4  ;;  %s57_s13 = sshll.u32 %s855_s30, 4  ;;  %s31_s29 = int_to_ptr.vmem [resolvable:$true] %s30_s29  ;;  %s58_s13 = int_to_ptr.vmem [resolvable:$true] %s57_s13 }
  0x13   :  { %s707_s14 = scalar_lea.vmem %s31_s29, 128  ;;  %p712_p6 = scmp.lt.s32.totalorder %s31_s29, %s31_s29 }
  0x14   :  { %p708_p5 = scmp.ne.s32.totalorder %s31_s29, %s707_s14  ;;  %p713_p7 = scmp.lt.s32.totalorder %s707_s14, %s707_s14 }
  0x16   :  { %p714_p8 = por %p713_p7, %p712_p6 }
  0x18   :  { %p715_p9 = pnand %p714_p8, %p708_p5 }
  0x1a   :  { %718 = shalt.err (!%p715_p9)
}
  0x1b   :  { %33 = dma.hbm_to_vmem [thread:$0]  %s1006_s0, 128, %s31_s29, [#allocation3]  }
  0x1c   :  { %s727_s17 = scalar_lea.vmem %s58_s13, 1024  ;;  %p732_p11 = scmp.lt.s32.totalorder %s58_s13, %s58_s13 }
  0x1d   :  { %p728_p10 = scmp.ne.s32.totalorder %s58_s13, %s727_s17  ;;  %p733_p12 = scmp.lt.s32.totalorder %s727_s17, %s727_s17 }
  0x1f   :  { %p734_p13 = por %p733_p12, %p732_p11 }
  0x21   :  { %p735_p0 = pnand %p734_p13, %p728_p10 }
  0x23   :  { %738 = shalt.err (!%p735_p0)
}
  0x24   :  { %63 = dma.hbm_to_vmem [thread:$0]  %s1011_s5, 1024, %s58_s13, [#allocation6], %s852_s24, %s852_s24, %s853_s25  }
  0x25   :  { %s856_s19 = smov [#allocation8]  }
  0x26   :  { %s71_s20 = sshll.u32 %s856_s19, 4  ;;  %s72_s20 = int_to_ptr.vmem [resolvable:$true] %s71_s20 }
  0x27   :  { %s747_s21 = scalar_lea.vmem %s72_s20, 1024  ;;  %p752_p2 = scmp.lt.s32.totalorder %s72_s20, %s72_s20 }
  0x28   :  { %p748_p1 = scmp.ne.s32.totalorder %s72_s20, %s747_s21  ;;  %p753_p3 = scmp.lt.s32.totalorder %s747_s21, %s747_s21 }
  0x2a   :  { %p754_p4 = por %p753_p3, %p752_p2 }
  0x2c   :  { %p755_p5 = pnand %p754_p4, %p748_p1 }
  0x2e   :  { %758 = shalt.err (!%p755_p5)
}
  0x2f   :  { %77 = dma.hbm_to_vmem [thread:$0]  %s1013_s7, 1024, %s72_s20, [#allocation9], %s852_s24, %s852_s24, %s853_s25  }
  0x30   :  { %839 = dma.done.wait [#allocation3], 128  }
  0x31   :  { %840 = vsyncadd [#allocation3], 4294967168 }
  0x32   :  { %841 = dma.done.wait [#allocation6], 2048  }
  0x33   :  { %842 = vsyncadd [#allocation6], 4294965248 }
  0x34   :  { %843 = dma.done.wait [#allocation9], 1024  }
  0x35   :  { %844 = vsyncadd [#allocation9], 4294966272  ;;  %v93_v0 = vld [vmem:[#allocation2] sm:$0xff]  ;;  %v857_v3 = vmov 0.0   ;;  %v655_v4 = vld [vmem:[#allocation5 + $0x30] sm:$0xff]   ;;  %v98_v6 = vlaneseq  ;;  %vm858_vm1 = vmmov 0  }
  0x36   :  { %94 = vadd.xlane.f32.xlu0 %v93_v0  ;;  %v653_v1 = vld [vmem:[#allocation5 + $0x38] sm:$0xff]   ;;  %581 = vmatprep.subr.bf16.mxu0 %v857_v3  ;;  %v656_v5 = vld [vmem:[#allocation7 + $0x30] sm:$0xff]   ;;  %v657_v13 = vld [vmem:[#allocation5 + $0x28] sm:$0xff]  }
  0x37   :  { %v654_v2 = vld [vmem:[#allocation7 + $0x38] sm:$0xff]   ;;  %601 = vmatprep.subr.bf16.mxu1 %v857_v3  ;;  %582 = vmatpush3.bf16.msra.mxu0 %v653_v1  ;;  %v99_v7 = vand.u32 127, %v98_v6  ;;  %v658_v14 = vld [vmem:[#allocation7 + $0x28] sm:$0xff]   ;;  %v659_v15 = vld [vmem:[#allocation5 + $0x20] sm:$0xff]  }
  0x38   :  { %602 = vmatpush3.bf16.msra.mxu1 %v654_v2  ;;  %583 = vmatprep.subr.bf16.mxu0 %v857_v3  ;;  %v660_v16 = vld [vmem:[#allocation7 + $0x20] sm:$0xff]   ;;  %v661_v17 = vld [vmem:[#allocation5 + $0x18] sm:$0xff]   ;;  %v663_v19 = vld [vmem:[#allocation5 + $0x10] sm:$0xff]  }
  0x39   :  { %603 = vmatprep.subr.bf16.mxu1 %v857_v3  ;;  %vm100_vm0 = vcmp.lt.s32.totalorder %v99_v7, 32  ;;  %597 = vmatprep.mubr.msk.bf16.mxu0 %vm858_vm1, %v857_v3  ;;  %v662_v18 = vld [vmem:[#allocation7 + $0x18] sm:$0xff]   ;;  %v664_v20 = vld [vmem:[#allocation7 + $0x10] sm:$0xff]   ;;  %v665_v21 = vld [vmem:[#allocation5 + $0x8] sm:$0xff]  }
  0x3a   :  { %617 = vmatprep.mubr.msk.bf16.mxu1 %vm858_vm1, %v857_v3  ;;  %v666_v22 = vld [vmem:[#allocation7 + $0x8] sm:$0xff]   ;;  %v667_v23 = vld [vmem:[#allocation5] sm:$0xff]   ;;  %v525_v29 = vld [vmem:[%s1007_s1] ss:$0 sm:$0xff]  ;;  %s859_s1 = smov [#allocation10]  }
  0x3b   :  { %584 = vmatpush3.bf16.msra.mxu0 %v655_v4  ;;  %v668_v24 = vld [vmem:[#allocation7] sm:$0xff]   ;;  %v526_v31 = vld [vmem:[%s1008_s2] ss:$0 sm:$0xff]  ;;  %v670_v36 = vld [vmem:[#allocation8 + $0x30] sm:$0xff]   ;;  %s473_s2 = sshll.u32 %s859_s1, 4  ;;  %s474_s2 = int_to_ptr.vmem [resolvable:$true] %s473_s2 }
  0x3c   :  { %604 = vmatpush3.bf16.msra.mxu1 %v656_v5  ;;  %585 = vmatprep.subr.bf16.mxu0 %v857_v3  ;;  %v669_v34 = vld [vmem:[#allocation8 + $0x38] sm:$0xff]   ;;  %v671_v37 = vld [vmem:[#allocation8 + $0x28] sm:$0xff]   ;;  %v672_v38 = vld [vmem:[#allocation8 + $0x20] sm:$0xff]   ;;  %s759_s25 = scalar_lea.vmem %s474_s2, 128  ;;  %p764_p7 = scmp.lt.s32.totalorder %s474_s2, %s474_s2 }
  0x3d   :  { %605 = vmatprep.subr.bf16.mxu1 %v857_v3  ;;  %v673_v39 = vld [vmem:[#allocation8 + $0x18] sm:$0xff]   ;;  %v674_v40 = vld [vmem:[#allocation8 + $0x10] sm:$0xff]   ;;  %v675_v41 = vld [vmem:[#allocation8 + $0x8] sm:$0xff]   ;;  %p760_p6 = scmp.ne.s32.totalorder %s474_s2, %s759_s25  ;;  %p765_p8 = scmp.lt.s32.totalorder %s759_s25, %s759_s25 }
  0x3e   :  { %v676_v42 = vld [vmem:[#allocation8] sm:$0xff]  }
  0x3f   :  { %586 = vmatpush3.bf16.msra.mxu0 %v657_v13  ;;  %p766_p9 = por %p765_p8, %p764_p7 }
  0x40   :  { %606 = vmatpush3.bf16.msra.mxu1 %v658_v14  ;;  %587 = vmatprep.subr.bf16.mxu0 %v857_v3 }
  0x41   :  { %607 = vmatprep.subr.bf16.mxu1 %v857_v3  ;;  %p767_p10 = pnand %p766_p9, %p760_p6 }
  0x43   :  { %588 = vmatpush3.bf16.msra.mxu0 %v659_v15 }
  0x44   :  { %608 = vmatpush3.bf16.msra.mxu1 %v660_v16  ;;  %589 = vmatprep.subr.bf16.mxu0 %v857_v3 }
  0x45   :  { %609 = vmatprep.subr.bf16.mxu1 %v857_v3 }
  0x47   :  { %590 = vmatpush3.bf16.msra.mxu0 %v661_v17 }
  0x48   :  { %610 = vmatpush3.bf16.msra.mxu1 %v662_v18  ;;  %591 = vmatprep.subr.bf16.mxu0 %v857_v3 }
  0x49   :  { %611 = vmatprep.subr.bf16.mxu1 %v857_v3 }
  0x4b   :  { %592 = vmatpush3.bf16.msra.mxu0 %v663_v19 }
  0x4c   :  { %612 = vmatpush3.bf16.msra.mxu1 %v664_v20  ;;  %593 = vmatprep.subr.bf16.mxu0 %v857_v3 }
  0x4d   :  { %613 = vmatprep.subr.bf16.mxu1 %v857_v3 }
  0x4f   :  { %594 = vmatpush3.bf16.msra.mxu0 %v665_v21 }
  0x50   :  { %614 = vmatpush3.bf16.msra.mxu1 %v666_v22  ;;  %595 = vmatprep.subr.bf16.mxu0 %v857_v3 }
  0x51   :  { %615 = vmatprep.subr.bf16.mxu1 %v857_v3 }
  0x53   :  { %596 = vmatpush3.bf16.msra.mxu0 %v667_v23 }
  0x54   :  { %616 = vmatpush3.bf16.msra.mxu1 %v668_v24  ;;  %621 = vmatprep.subr.bf16.mxu0 %v857_v3 }
  0xbf   :  { %v95_v8 = vpop.xlane.xlu0 %94 }
  0xc0   :  { %v96_v9 = vmul.f32 0.03125, %v95_v8 }
  0xc2   :  { %v97_v10 = vsub.f32 %v93_v0, %v96_v9 }
  0xc4   :  { %v101_v11 = vsel %vm100_vm0, %v97_v10, 0.0 }
  0xc5   :  { %v102_v12 = vmul.f32 %v101_v11, %v101_v11 }
  0xc7   :  { %103 = vadd.xlane.f32.xlu0 %v102_v12 }
 0x150   :  { %v104_v25 = vpop.xlane.xlu0 %103 }
 0x151   :  { %v105_v26 = vmul.f32 0.03125, %v104_v25 }
 0x153   :  { %v106_v27 = vadd.f32 1e-05, %v105_v26 }
 0x155   :  { %677 = vrsqrt.f32 %v106_v27 }
 0x162   :  { %v678_v28 = vpop.eup %677 }
 0x163   :  { %v108_v30 = vmul.f32 %v678_v28, %v101_v11 }
 0x165   :  { %v116_v32 = vmul.f32 %v525_v29, %v108_v30 }
 0x167   :  { %v124_v33 = vadd.f32 %v526_v31, %v116_v32 }
 0x169   :  { %v126_v35 = vpack.c.bf16 %v124_v33, %v124_v33  ;;  %125 = vst [vmem:[#allocation10] sm:$0xff] %v124_v33 }
 0x16b   :  { %598 = vmatmul.mubr.bf16.vlgmr.msra.gmra.mxu0 %v126_v35  ;;  %618 = vmatmul.mubr.bf16.vlgmr.msra.gmra.mxu1 %v126_v35 }
 0x16c   :  { %622 = vmatpush3.bf16.msra.mxu0 %v669_v34  ;;  %637 = vmatprep.mubr.msk.bf16.mxu0 %vm858_vm1, %v857_v3 }
 0x16d   :  { %623 = vmatprep.subr.bf16.mxu0 %v857_v3 }
 0x170   :  { %624 = vmatpush3.bf16.msra.mxu0 %v670_v36 }
 0x171   :  { %625 = vmatprep.subr.bf16.mxu0 %v857_v3 }
 0x174   :  { %626 = vmatpush3.bf16.msra.mxu0 %v671_v37 }
 0x175   :  { %627 = vmatprep.subr.bf16.mxu0 %v857_v3 }
 0x178   :  { %628 = vmatpush3.bf16.msra.mxu0 %v672_v38 }
 0x179   :  { %629 = vmatprep.subr.bf16.mxu0 %v857_v3 }
 0x17c   :  { %630 = vmatpush3.bf16.msra.mxu0 %v673_v39 }
 0x17d   :  { %631 = vmatprep.subr.bf16.mxu0 %v857_v3 }
 0x180   :  { %632 = vmatpush3.bf16.msra.mxu0 %v674_v40 }
 0x181   :  { %633 = vmatprep.subr.bf16.mxu0 %v857_v3 }
 0x184   :  { %634 = vmatpush3.bf16.msra.mxu0 %v675_v41 }
 0x185   :  { %635 = vmatprep.subr.bf16.mxu0 %v857_v3 }
 0x188   :  { %636 = vmatpush3.bf16.msra.mxu0 %v676_v42 }
 0x18b   :  { %638 = vmatmul.mubr.bf16.vlgmr.msra.gmra.mxu0 %v126_v35 }
 0x18c   :  { %770 = shalt.err (!%p767_p10)
}
 0x18d   :  { %476 = dma.vmem_to_hbm [thread:$0]  %s474_s2, 128, %s1015_s9, [#allocation4]   ;;  %v527_v43 = vld [vmem:[%s1010_s4] ss:$0 sm:$0xff] }
 0x18e   :  { %v536_v44 = vld [vmem:[%s1012_s6] ss:$0 sm:$0xff]  ;;  %s860_s14 = smov [#allocation11]   ;;  %s861_s16 = smov [#allocation13]  }
 0x18f   :  { %s483_s15 = sshll.u32 %s860_s14, 4  ;;  %s493_s9 = sshll.u32 %s861_s16, 4  ;;  %s484_s15 = int_to_ptr.vmem [resolvable:$true] %s483_s15  ;;  %s494_s9 = int_to_ptr.vmem [resolvable:$true] %s493_s9 }
 0x190   :  { %s779_s4 = scalar_lea.vmem %s484_s15, 64  ;;  %p784_p12 = scmp.lt.s32.totalorder %s484_s15, %s484_s15 }
 0x191   :  { %p780_p11 = scmp.ne.s32.totalorder %s484_s15, %s779_s4  ;;  %p785_p13 = scmp.lt.s32.totalorder %s779_s4, %s779_s4 }
 0x193   :  { %p786_p0 = por %p785_p13, %p784_p12 }
 0x195   :  { %p787_p1 = pnand %p786_p0, %p780_p11 }
 0x22b   :  { %v232_v45 = vpop.f32.mrf.mxu0  ;;  %v346_v46 = vpop.f32.mrf.mxu1 }
 0x22c   :  { %v233_v47 = vadd.f32 %v527_v43, %v232_v45  ;;  %v347_v48 = vadd.f32 %v536_v44, %v346_v46 }
 0x22d   :  { %v599_v49 = vpop.f32.mrf.mxu0  ;;  %v619_v50 = vpop.f32.mrf.mxu1 }
 0x22e   :  { %v238_v51 = vmul.f32 0.35355338, %v233_v47  ;;  %v352_v52 = vpack.c.bf16 %v347_v48, %v347_v48 }
 0x22f   :  { %v235_v53 = vpop.f32.mrf.mxu0  ;;  %v349_v54 = vpop.f32.mrf.mxu1 }
 0x230   :  { %v239_v55 = vpack.c.bf16 %v238_v51, %v238_v51  ;;  %353 = vst [vmem:[#allocation13] sm:$0xf] %v352_v52 }
 0x231   :  { %v600_v56 = vpop.f32.mrf.mxu0  ;;  %v620_v57 = vpop.f32.mrf.mxu1 }
 0x232   :  { %240 = vst [vmem:[#allocation11] sm:$0xf] %v239_v55 }
 0x233   :  { %790 = shalt.err (!%p787_p1)
}
 0x234   :  { %486 = dma.vmem_to_hbm [thread:$0]  %s484_s15, 64, %s1016_s10, [#allocation12]  }
 0x235   :  { %s799_s3 = scalar_lea.vmem %s494_s9, 64  ;;  %p804_p3 = scmp.lt.s32.totalorder %s494_s9, %s494_s9 }
 0x236   :  { %p800_p2 = scmp.ne.s32.totalorder %s494_s9, %s799_s3  ;;  %p805_p4 = scmp.lt.s32.totalorder %s799_s3, %s799_s3 }
 0x238   :  { %p806_p5 = por %p805_p4, %p804_p3 }
 0x23a   :  { %p807_p6 = pnand %p806_p5, %p800_p2 }
 0x23c   :  { %810 = shalt.err (!%p807_p6)
}
 0x23d   :  { %496 = dma.vmem_to_hbm [thread:$0]  %s494_s9, 64, %s1017_s11, [#allocation12]   ;;  %v545_v58 = vld [vmem:[%s1014_s8] ss:$0 sm:$0xff] }
 0x23e   :  { %s862_s0 = smov [#allocation14]  }
 0x23f   :  { %s503_s22 = sshll.u32 %s862_s0, 4  ;;  %s504_s22 = int_to_ptr.vmem [resolvable:$true] %s503_s22 }
 0x240   :  { %s819_s10 = scalar_lea.vmem %s504_s22, 64  ;;  %p824_p8 = scmp.lt.s32.totalorder %s504_s22, %s504_s22 }
 0x241   :  { %p820_p7 = scmp.ne.s32.totalorder %s504_s22, %s819_s10  ;;  %p825_p9 = scmp.lt.s32.totalorder %s819_s10, %s819_s10 }
 0x243   :  { %p826_p10 = por %p825_p9, %p824_p8 }
 0x245   :  { %p827_p11 = pnand %p826_p10, %p820_p7 }
 0x24b   :  { %v459_v59 = vpop.f32.mrf.mxu0 }
 0x24c   :  { %v460_v60 = vadd.f32 %v545_v58, %v459_v59 }
 0x24d   :  { %v639_v61 = vpop.f32.mrf.mxu0 }
 0x24e   :  { %v465_v62 = vpack.c.bf16 %v460_v60, %v460_v60 }
 0x24f   :  { %v462_v63 = vpop.f32.mrf.mxu0 }
 0x250   :  { %466 = vst [vmem:[#allocation14] sm:$0xf] %v465_v62 }
 0x251   :  { %v640_v0 = vpop.f32.mrf.mxu0 }
 0x252   :  { %830 = shalt.err (!%p827_p11)
}
 0x253   :  { %506 = dma.vmem_to_hbm [thread:$0]  %s504_s22, 64, %s1018_s12, [#allocation15]  }
 0x254   :  { %845 = dma.done.wait [#allocation4], 128  }
 0x255   :  { %846 = vsyncadd [#allocation4], 4294967168 }
 0x256   :  { %847 = dma.done.wait [#allocation12], 128  }
 0x257   :  { %848 = vsyncadd [#allocation12], 4294967168 }
 0x258   :  { %849 = dma.done.wait [#allocation15], 64  }
 0x259   :  { %850 = vsyncadd [#allocation15], 4294967232 }
 0x25a   :  { %519 = vsyncpa [#allocation3], 1 }
 0x25b   :  { %520 = vsyncpa [#allocation6], 1 }
 0x25c   :  { %521 = vsyncpa [#allocation9], 1 }
 0x25d   :  { %522 = vsyncpa [#allocation4], 1 }
 0x25e   :  { %523 = vsyncpa [#allocation12], 1 }
 0x25f   :  { %524 = vsyncpa [#allocation15], 1 }

</bundles_post_ra>
